<compile_context>
chip_gen: v7x
topology: tpu7x:2x2x1
jax: 0.10.0
libtpu: 0.0.40
codegen_flags: <defaults>
</compile_context>

<pallas_src>
import functools

import jax
import jax.numpy as jnp
from jax.experimental import pallas as pl
from jax.experimental.pallas import tpu as pltpu


def _round_up(x, m):
    return ((x + m - 1) // m) * m


def casec_rnn_kernel(x_ref, h0_ref,
                     w1_ref, b1_ref,
                     wir_ref, wiz_ref, win_ref,
                     whr_ref, whz_ref, whn_ref,
                     br_ref, bz_ref, bin_ref, bhn_ref,
                     w2ar_ref, b2ar_ref,
                     q_ref, hout_ref,
                     h_scr, *, mxu_dtype):
    t = pl.program_id(1)

    # Initialize the carried hidden state once per batch block.
    @pl.when(t == 0)
    def _init():
        h_scr[...] = h0_ref[...]

    h_in = h_scr[...]                       # f32 carry
    hc = h_in.astype(mxu_dtype)

    def mm(a, w_ref):
        return jnp.dot(a, w_ref[...], preferred_element_type=jnp.float32)

    # fc1 + relu  (x_ref is already in mxu_dtype from the wrapper)
    x = jnp.maximum(mm(x_ref[...], w1_ref) + b1_ref[...], 0.0)
    xc = x.astype(mxu_dtype)

    # GRUCell, per-gate lane-aligned matmuls; elementwise math stays f32.
    r = jax.nn.sigmoid(mm(xc, wir_ref) + mm(hc, whr_ref) + br_ref[...])
    z = jax.nn.sigmoid(mm(xc, wiz_ref) + mm(hc, whz_ref) + bz_ref[...])
    n = jnp.tanh(mm(xc, win_ref) + bin_ref[...] +
                 r * (mm(hc, whn_ref) + bhn_ref[...]))
    h_new = (1.0 - z) * n + z * h_in
    h_scr[...] = h_new

    # fc2 folded with action_repr: q = h' @ (W2 @ ar.T) + (b2 @ ar.T).
    # Output is padded to 128 lanes -> unmasked lane-dense store.
    q_ref[...] = mm(h_new.astype(mxu_dtype), w2ar_ref) + b2ar_ref[...]

    # Final hidden state written once, at the last timestep of this block.
    @pl.when(t == pl.num_programs(1) - 1)
    def _final():
        hout_ref[...] = h_new


def casec_rnn_agent_forward_seq(inputs_seq, h0, action_repr, params, *,
                                block_b=None, mxu_dtype=jnp.float32):
    """inputs_seq: (T, B, F), h0: (B, H), action_repr: (A, L) -> (T,B,A), (B,H)."""
    T, B, F = inputs_seq.shape
    H = h0.shape[-1]
    A = action_repr.shape[0]
    A_pad = _round_up(A, 128)

    TB = B if block_b is None else block_b
    assert B % TB == 0, "block_b must divide B"
    nb = B // TB

    f32 = jnp.float32

    # ---- wrapper-side folds (no kernel cost) ----
    w_ih, w_hh = params["w_ih"], params["w_hh"]          # (H, 3H), (in, out)
    b_ih, b_hh = params["b_ih"], params["b_hh"]          # (1, 3H)
    w_ir, w_iz, w_in_ = w_ih[:, :H], w_ih[:, H:2 * H], w_ih[:, 2 * H:]
    w_hr, w_hz, w_hn = w_hh[:, :H], w_hh[:, H:2 * H], w_hh[:, 2 * H:]
    b_r = (b_ih[:, :H] + b_hh[:, :H]).astype(f32)
    b_z = (b_ih[:, H:2 * H] + b_hh[:, H:2 * H]).astype(f32)
    b_in_ = b_ih[:, 2 * H:].astype(f32)
    b_hn = b_hh[:, 2 * H:].astype(f32)

    w2ar = params["w2"] @ action_repr.T                  # (H, A)
    b2ar = params["b2"] @ action_repr.T                  # (1, A)
    w2ar = jnp.pad(w2ar, ((0, 0), (0, A_pad - A)))
    b2ar = jnp.pad(b2ar, ((0, 0), (0, A_pad - A))).astype(f32)

    md = mxu_dtype
    x_seq = inputs_seq.astype(md)
    w1 = params["w1"].astype(md)
    gate_ws = [w.astype(md) for w in (w_ir, w_iz, w_in_, w_hr, w_hz, w_hn)]
    w2ar = w2ar.astype(md)

    args = (x_seq, h0.astype(f32),
            w1, params["b1"].astype(f32),
            gate_ws[0], gate_ws[1], gate_ws[2],
            gate_ws[3], gate_ws[4], gate_ws[5],
            b_r, b_z, b_in_, b_hn,
            w2ar, b2ar)

    def const2(b, t):
        return (0, 0)

    in_specs = [
        pl.BlockSpec((None, TB, F), lambda b, t: (t, b, 0)),   # x_seq (squeezed T)
        pl.BlockSpec((TB, H), lambda b, t: (b, 0)),            # h0
        pl.BlockSpec((F, H), const2),                          # w1
        pl.BlockSpec((1, H), const2),                          # b1
        pl.BlockSpec((H, H), const2),                          # w_ir
        pl.BlockSpec((H, H), const2),                          # w_iz
        pl.BlockSpec((H, H), const2),                          # w_in
        pl.BlockSpec((H, H), const2),                          # w_hr
        pl.BlockSpec((H, H), const2),                          # w_hz
        pl.BlockSpec((H, H), const2),                          # w_hn
        pl.BlockSpec((1, H), const2),                          # b_r
        pl.BlockSpec((1, H), const2),                          # b_z
        pl.BlockSpec((1, H), const2),                          # b_in
        pl.BlockSpec((1, H), const2),                          # b_hn
        pl.BlockSpec((H, A_pad), const2),                      # w2ar
        pl.BlockSpec((1, A_pad), const2),                      # b2ar
    ]
    out_specs = [
        pl.BlockSpec((None, TB, A_pad), lambda b, t: (t, b, 0)),  # q_seq (lane-dense)
        pl.BlockSpec((TB, H), lambda b, t: (b, 0)),               # h_out
    ]

    grid_spec = pltpu.PrefetchScalarGridSpec(
        num_scalar_prefetch=0,
        grid=(nb, T),
        in_specs=in_specs,
        out_specs=out_specs,
        scratch_shapes=[pltpu.VMEM((TB, H), jnp.float32)],   # carried hidden state
    )

    q_pad, h_last = pl.pallas_call(
        functools.partial(casec_rnn_kernel, mxu_dtype=md),
        out_shape=(jax.ShapeDtypeStruct((T, B, A_pad), jnp.float32),
                   jax.ShapeDtypeStruct((B, H), jnp.float32)),
        grid_spec=grid_spec,
        compiler_params=pltpu.CompilerParams(
            dimension_semantics=("parallel", "arbitrary")),
    )(*args)

    return q_pad[..., :A], h_last


def casec_rnn_agent_forward(inputs, hidden_state, action_repr, params, **kw):
    """Single-step forward matching the PyTorch module. inputs: (B, F)."""
    H = params["w1"].shape[1]
    h_in = hidden_state.reshape(-1, H)
    q_seq, h = casec_rnn_agent_forward_seq(inputs[None], h_in, action_repr,
                                           params, **kw)
    return q_seq[0], h


def make_params(key, input_shape, hidden_dim, action_latent_dim):
    ks = jax.random.split(key, 8)
    scale = 0.1
    # Stored pre-transposed: (in_features, out_features); GRU gates fused [r,z,n].
    w1 = scale * jax.random.normal(ks[0], (input_shape, hidden_dim), jnp.float32)
    b1 = scale * jax.random.normal(ks[1], (1, hidden_dim), jnp.float32)
    w_ih = scale * jax.random.normal(ks[2], (hidden_dim, 3 * hidden_dim), jnp.float32)
    w_hh = scale * jax.random.normal(ks[3], (hidden_dim, 3 * hidden_dim), jnp.float32)
    b_ih = scale * jax.random.normal(ks[4], (1, 3 * hidden_dim), jnp.float32)
    b_hh = scale * jax.random.normal(ks[5], (1, 3 * hidden_dim), jnp.float32)
    w2 = scale * jax.random.normal(ks[6], (hidden_dim, action_latent_dim), jnp.float32)
    b2 = scale * jax.random.normal(ks[7], (1, action_latent_dim), jnp.float32)
    return dict(w1=w1, b1=b1, w_ih=w_ih, w_hh=w_hh, b_ih=b_ih, b_hh=b_hh,
                w2=w2, b2=b2)


def reference_step(x, h, action_repr, p):
    H = h.shape[-1]
    xx = jnp.maximum(x @ p["w1"] + p["b1"], 0.0)
    gi = xx @ p["w_ih"] + p["b_ih"]
    gh = h @ p["w_hh"] + p["b_hh"]
    r = jax.nn.sigmoid(gi[:, :H] + gh[:, :H])
    z = jax.nn.sigmoid(gi[:, H:2 * H] + gh[:, H:2 * H])
    n = jnp.tanh(gi[:, 2 * H:] + r * gh[:, 2 * H:])
    h_new = (1.0 - z) * n + z * h
    key = h_new @ p["w2"] + p["b2"]
    q = key @ action_repr.T
    return q, h_new


def reference_seq(x_seq, h0, action_repr, p):
    qs, h = [], h0
    for t in range(x_seq.shape[0]):
        q, h = reference_step(x_seq[t], h, action_repr, p)
        qs.append(q)
    return jnp.stack(qs), h


if __name__ == "__main__":
    # Small shapes consistent with the module: batch (= bs * n_agents), obs
    # feature dim, rnn_hidden_dim, n_actions, action_latent_dim, rollout T.
    T, B, F, H, A, L = 4, 8, 32, 64, 8, 16

    root = jax.random.PRNGKey(0)
    k_in, k_h, k_ar, k_p = jax.random.split(root, 4)

    inputs_seq = jax.random.normal(k_in, (T, B, F), jnp.float32)
    hidden = jax.random.normal(k_h, (B, H), jnp.float32)
    action_repr = jax.random.normal(k_ar, (A, L), jnp.float32)
    params = make_params(k_p, F, H, L)

    # Multi-step rollout (time loop inside the kernel, weights VMEM-resident).
    # NOTE: on v6e/v7x pass mxu_dtype=jnp.bfloat16 for ~2x MXU throughput;
    # f32 kept here so the numerical check is tight.
    q_seq, h_seq = casec_rnn_agent_forward_seq(inputs_seq, hidden, action_repr,
                                               params)
    # Single-step call matching the original module interface.
    q1, h1 = casec_rnn_agent_forward(inputs_seq[0], hidden, action_repr, params)
    jax.block_until_ready((q_seq, h_seq, q1, h1))

    q_seq_ref, h_seq_ref = reference_seq(inputs_seq, hidden, action_repr, params)
    q1_ref, h1_ref = reference_step(inputs_seq[0], hidden, action_repr, params)

    assert q_seq.shape == (T, B, A) and h_seq.shape == (B, H)
    assert q1.shape == (B, A) and h1.shape == (B, H)
    assert jnp.allclose(q_seq, q_seq_ref, atol=1e-4, rtol=1e-4)
    assert jnp.allclose(h_seq, h_seq_ref, atol=1e-4, rtol=1e-4)
    assert jnp.allclose(q1, q1_ref, atol=1e-4, rtol=1e-4)
    assert jnp.allclose(h1, h1_ref, atol=1e-4, rtol=1e-4)

    print("KERNEL_OK")
</pallas_src>

<mosaic_0001>
module attributes {stable_mosaic.version = 11 : i64} {
  func.func @casec_rnn_kernel(%arg0: i32, %arg1: i32, %arg2: memref<1x8x32xf32, #tpu.memory_space<vmem>>, %arg3: memref<8x64xf32, #tpu.memory_space<vmem>>, %arg4: memref<32x64xf32, #tpu.memory_space<vmem>>, %arg5: memref<1x64xf32, #tpu.memory_space<vmem>>, %arg6: memref<64x64xf32, #tpu.memory_space<vmem>>, %arg7: memref<64x64xf32, #tpu.memory_space<vmem>>, %arg8: memref<64x64xf32, #tpu.memory_space<vmem>>, %arg9: memref<64x64xf32, #tpu.memory_space<vmem>>, %arg10: memref<64x64xf32, #tpu.memory_space<vmem>>, %arg11: memref<64x64xf32, #tpu.memory_space<vmem>>, %arg12: memref<1x64xf32, #tpu.memory_space<vmem>>, %arg13: memref<1x64xf32, #tpu.memory_space<vmem>>, %arg14: memref<1x64xf32, #tpu.memory_space<vmem>>, %arg15: memref<1x64xf32, #tpu.memory_space<vmem>>, %arg16: memref<64x128xf32, #tpu.memory_space<vmem>>, %arg17: memref<1x128xf32, #tpu.memory_space<vmem>>, %arg18: memref<1x8x128xf32, #tpu.memory_space<vmem>>, %arg19: memref<8x64xf32, #tpu.memory_space<vmem>>, %arg20: memref<8x64xf32, #tpu.memory_space<vmem>>) attributes {dimension_semantics = [#tpu.dimension_semantics<parallel>, #tpu.dimension_semantics<arbitrary>], iteration_bounds = array<i64: 1, 4>, scalar_prefetch = 0 : i64, scratch_operands = 1 : i64, tpu.core_type = #tpu.core_type<tc>, window_params = [{transform_indices = @transform_0, window_bounds = array<i64: 1, 8, 32>}, {transform_indices = @transform_1, window_bounds = array<i64: 8, 64>}, {pipeline_mode = #tpu.pipeline_mode<synchronous>, transform_indices = @transform_2, window_bounds = array<i64: 32, 64>}, {pipeline_mode = #tpu.pipeline_mode<synchronous>, transform_indices = @transform_3, window_bounds = array<i64: 1, 64>}, {pipeline_mode = #tpu.pipeline_mode<synchronous>, transform_indices = @transform_4, window_bounds = array<i64: 64, 64>}, {pipeline_mode = #tpu.pipeline_mode<synchronous>, transform_indices = @transform_5, window_bounds = array<i64: 64, 64>}, {pipeline_mode = #tpu.pipeline_mode<synchronous>, transform_indices = @transform_6, window_bounds = array<i64: 64, 64>}, {pipeline_mode = #tpu.pipeline_mode<synchronous>, transform_indices = @transform_7, window_bounds = array<i64: 64, 64>}, {pipeline_mode = #tpu.pipeline_mode<synchronous>, transform_indices = @transform_8, window_bounds = array<i64: 64, 64>}, {pipeline_mode = #tpu.pipeline_mode<synchronous>, transform_indices = @transform_9, window_bounds = array<i64: 64, 64>}, {pipeline_mode = #tpu.pipeline_mode<synchronous>, transform_indices = @transform_10, window_bounds = array<i64: 1, 64>}, {pipeline_mode = #tpu.pipeline_mode<synchronous>, transform_indices = @transform_11, window_bounds = array<i64: 1, 64>}, {pipeline_mode = #tpu.pipeline_mode<synchronous>, transform_indices = @transform_12, window_bounds = array<i64: 1, 64>}, {pipeline_mode = #tpu.pipeline_mode<synchronous>, transform_indices = @transform_13, window_bounds = array<i64: 1, 64>}, {pipeline_mode = #tpu.pipeline_mode<synchronous>, transform_indices = @transform_14, window_bounds = array<i64: 64, 128>}, {pipeline_mode = #tpu.pipeline_mode<synchronous>, transform_indices = @transform_15, window_bounds = array<i64: 1, 128>}, {transform_indices = @transform_16, window_bounds = array<i64: 1, 8, 128>}, {transform_indices = @transform_17, window_bounds = array<i64: 8, 64>}]} {
    %c0_i32 = arith.constant 0 : i32
    %0 = arith.cmpi eq, %arg1, %c0_i32 : i32
    %1 = arith.extui %0 : i1 to i32
    %c0_i32_0 = arith.constant 0 : i32
    %2 = arith.cmpi ne, %1, %c0_i32_0 : i32
    scf.if %2 {
      %c0_50 = arith.constant 0 : index
      %c0_51 = arith.constant 0 : index
      %69 = vector.load %arg3[%c0_50, %c0_51] : memref<8x64xf32, #tpu.memory_space<vmem>>, vector<8x64xf32>
      %c0_52 = arith.constant 0 : index
      %c0_53 = arith.constant 0 : index
      %70 = vector.load %arg20[%c0_52, %c0_53] : memref<8x64xf32, #tpu.memory_space<vmem>>, vector<8x64xf32>
      tpu.vector_store %arg20[%c0_52, %c0_53], %69 {strides = array<i32>} : memref<8x64xf32, #tpu.memory_space<vmem>>, vector<8x64xf32>,
    } else {
    }
    %c0 = arith.constant 0 : index
    %c0_1 = arith.constant 0 : index
    %3 = vector.load %arg20[%c0, %c0_1] : memref<8x64xf32, #tpu.memory_space<vmem>>, vector<8x64xf32>
    %c0_2 = arith.constant 0 : index
    %c0_3 = arith.constant 0 : index
    %c0_4 = arith.constant 0 : index
    %4 = vector.load %arg2[%c0_2, %c0_3, %c0_4] : memref<1x8x32xf32, #tpu.memory_space<vmem>>, vector<1x8x32xf32>
    %5 = vector.shape_cast %4 : vector<1x8x32xf32> to vector<8x32xf32>
    %c0_5 = arith.constant 0 : index
    %c0_6 = arith.constant 0 : index
    %6 = vector.load %arg4[%c0_5, %c0_6] : memref<32x64xf32, #tpu.memory_space<vmem>>, vector<32x64xf32>
    %cst = arith.constant dense<0.000000e+00> : vector<8x64xf32>
    %7 = tpu.matmul %5, %6, %cst {dimension_numbers = #tpu.dot_dimension_numbers<[1], [0], [0], [1], [0, 0, 1, 1], [], []>} : vector<8x32xf32>, vector<32x64xf32>, vector<8x64xf32> -> vector<8x64xf32>
    %c0_7 = arith.constant 0 : index
    %c0_8 = arith.constant 0 : index
    %8 = vector.load %arg5[%c0_7, %c0_8] : memref<1x64xf32, #tpu.memory_space<vmem>>, vector<1x64xf32>
    %9 = vector.broadcast %8 : vector<1x64xf32> to vector<8x64xf32>
    %10 = arith.addf %7, %9 : vector<8x64xf32>
    %cst_9 = arith.constant 0.000000e+00 : f32
    %11 = vector.broadcast %cst_9 : f32 to vector<8x64xf32>
    %12 = arith.maximumf %10, %11 : vector<8x64xf32>
    %c0_10 = arith.constant 0 : index
    %c0_11 = arith.constant 0 : index
    %13 = vector.load %arg6[%c0_10, %c0_11] : memref<64x64xf32, #tpu.memory_space<vmem>>, vector<64x64xf32>
    %cst_12 = arith.constant dense<0.000000e+00> : vector<8x64xf32>
    %14 = tpu.matmul %12, %13, %cst_12 {dimension_numbers = #tpu.dot_dimension_numbers<[1], [0], [0], [1], [0, 0, 1, 1], [], []>} : vector<8x64xf32>, vector<64x64xf32>, vector<8x64xf32> -> vector<8x64xf32>
    %c0_13 = arith.constant 0 : index
    %c0_14 = arith.constant 0 : index
    %15 = vector.load %arg9[%c0_13, %c0_14] : memref<64x64xf32, #tpu.memory_space<vmem>>, vector<64x64xf32>
    %cst_15 = arith.constant dense<0.000000e+00> : vector<8x64xf32>
    %16 = tpu.matmul %3, %15, %cst_15 {dimension_numbers = #tpu.dot_dimension_numbers<[1], [0], [0], [1], [0, 0, 1, 1], [], []>} : vector<8x64xf32>, vector<64x64xf32>, vector<8x64xf32> -> vector<8x64xf32>
    %17 = arith.addf %14, %16 : vector<8x64xf32>
    %c0_16 = arith.constant 0 : index
    %c0_17 = arith.constant 0 : index
    %18 = vector.load %arg12[%c0_16, %c0_17] : memref<1x64xf32, #tpu.memory_space<vmem>>, vector<1x64xf32>
    %19 = vector.broadcast %18 : vector<1x64xf32> to vector<8x64xf32>
    %20 = arith.addf %17, %19 : vector<8x64xf32>
    %21 = arith.negf %20 : vector<8x64xf32>
    %22 = math.exp %21 : vector<8x64xf32>
    %cst_18 = arith.constant 1.000000e+00 : f32
    %23 = vector.broadcast %cst_18 : f32 to vector<8x64xf32>
    %24 = arith.addf %23, %22 : vector<8x64xf32>
    %25 = arith.divf %23, %24 : vector<8x64xf32>
    %c0_19 = arith.constant 0 : index
    %c0_20 = arith.constant 0 : index
    %26 = vector.load %arg7[%c0_19, %c0_20] : memref<64x64xf32, #tpu.memory_space<vmem>>, vector<64x64xf32>
    %cst_21 = arith.constant dense<0.000000e+00> : vector<8x64xf32>
    %27 = tpu.matmul %12, %26, %cst_21 {dimension_numbers = #tpu.dot_dimension_numbers<[1], [0], [0], [1], [0, 0, 1, 1], [], []>} : vector<8x64xf32>, vector<64x64xf32>, vector<8x64xf32> -> vector<8x64xf32>
    %c0_22 = arith.constant 0 : index
    %c0_23 = arith.constant 0 : index
    %28 = vector.load %arg10[%c0_22, %c0_23] : memref<64x64xf32, #tpu.memory_space<vmem>>, vector<64x64xf32>
    %cst_24 = arith.constant dense<0.000000e+00> : vector<8x64xf32>
    %29 = tpu.matmul %3, %28, %cst_24 {dimension_numbers = #tpu.dot_dimension_numbers<[1], [0], [0], [1], [0, 0, 1, 1], [], []>} : vector<8x64xf32>, vector<64x64xf32>, vector<8x64xf32> -> vector<8x64xf32>
    %30 = arith.addf %27, %29 : vector<8x64xf32>
    %c0_25 = arith.constant 0 : index
    %c0_26 = arith.constant 0 : index
    %31 = vector.load %arg13[%c0_25, %c0_26] : memref<1x64xf32, #tpu.memory_space<vmem>>, vector<1x64xf32>
    %32 = vector.broadcast %31 : vector<1x64xf32> to vector<8x64xf32>
    %33 = arith.addf %30, %32 : vector<8x64xf32>
    %34 = arith.negf %33 : vector<8x64xf32>
    %35 = math.exp %34 : vector<8x64xf32>
    %cst_27 = arith.constant 1.000000e+00 : f32
    %36 = vector.broadcast %cst_27 : f32 to vector<8x64xf32>
    %37 = arith.addf %36, %35 : vector<8x64xf32>
    %38 = arith.divf %36, %37 : vector<8x64xf32>
    %c0_28 = arith.constant 0 : index
    %c0_29 = arith.constant 0 : index
    %39 = vector.load %arg8[%c0_28, %c0_29] : memref<64x64xf32, #tpu.memory_space<vmem>>, vector<64x64xf32>
    %cst_30 = arith.constant dense<0.000000e+00> : vector<8x64xf32>
    %40 = tpu.matmul %12, %39, %cst_30 {dimension_numbers = #tpu.dot_dimension_numbers<[1], [0], [0], [1], [0, 0, 1, 1], [], []>} : vector<8x64xf32>, vector<64x64xf32>, vector<8x64xf32> -> vector<8x64xf32>
    %c0_31 = arith.constant 0 : index
    %c0_32 = arith.constant 0 : index
    %41 = vector.load %arg14[%c0_31, %c0_32] : memref<1x64xf32, #tpu.memory_space<vmem>>, vector<1x64xf32>
    %42 = vector.broadcast %41 : vector<1x64xf32> to vector<8x64xf32>
    %43 = arith.addf %40, %42 : vector<8x64xf32>
    %c0_33 = arith.constant 0 : index
    %c0_34 = arith.constant 0 : index
    %44 = vector.load %arg11[%c0_33, %c0_34] : memref<64x64xf32, #tpu.memory_space<vmem>>, vector<64x64xf32>
    %cst_35 = arith.constant dense<0.000000e+00> : vector<8x64xf32>
    %45 = tpu.matmul %3, %44, %cst_35 {dimension_numbers = #tpu.dot_dimension_numbers<[1], [0], [0], [1], [0, 0, 1, 1], [], []>} : vector<8x64xf32>, vector<64x64xf32>, vector<8x64xf32> -> vector<8x64xf32>
    %c0_36 = arith.constant 0 : index
    %c0_37 = arith.constant 0 : index
    %46 = vector.load %arg15[%c0_36, %c0_37] : memref<1x64xf32, #tpu.memory_space<vmem>>, vector<1x64xf32>
    %47 = vector.broadcast %46 : vector<1x64xf32> to vector<8x64xf32>
    %48 = arith.addf %45, %47 : vector<8x64xf32>
    %49 = arith.mulf %25, %48 : vector<8x64xf32>
    %50 = arith.addf %43, %49 : vector<8x64xf32>
    %51 = math.tanh %50 : vector<8x64xf32>
    %cst_38 = arith.constant 1.000000e+00 : f32
    %52 = vector.broadcast %cst_38 : f32 to vector<8x64xf32>
    %53 = arith.subf %52, %38 : vector<8x64xf32>
    %54 = arith.mulf %53, %51 : vector<8x64xf32>
    %55 = arith.mulf %38, %3 : vector<8x64xf32>
    %56 = arith.addf %54, %55 : vector<8x64xf32>
    %c0_39 = arith.constant 0 : index
    %c0_40 = arith.constant 0 : index
    %57 = vector.load %arg20[%c0_39, %c0_40] : memref<8x64xf32, #tpu.memory_space<vmem>>, vector<8x64xf32>
    tpu.vector_store %arg20[%c0_39, %c0_40], %56 {strides = array<i32>} : memref<8x64xf32, #tpu.memory_space<vmem>>, vector<8x64xf32>,
    %c0_41 = arith.constant 0 : index
    %c0_42 = arith.constant 0 : index
    %58 = vector.load %arg16[%c0_41, %c0_42] : memref<64x128xf32, #tpu.memory_space<vmem>>, vector<64x128xf32>
    %cst_43 = arith.constant dense<0.000000e+00> : vector<8x128xf32>
    %59 = tpu.matmul %56, %58, %cst_43 {dimension_numbers = #tpu.dot_dimension_numbers<[1], [0], [0], [1], [0, 0, 1, 1], [], []>} : vector<8x64xf32>, vector<64x128xf32>, vector<8x128xf32> -> vector<8x128xf32>
    %c0_44 = arith.constant 0 : index
    %c0_45 = arith.constant 0 : index
    %60 = vector.load %arg17[%c0_44, %c0_45] : memref<1x128xf32, #tpu.memory_space<vmem>>, vector<1x128xf32>
    %61 = vector.broadcast %60 : vector<1x128xf32> to vector<8x128xf32>
    %62 = arith.addf %59, %61 : vector<8x128xf32>
    %c0_46 = arith.constant 0 : index
    %c0_47 = arith.constant 0 : index
    %c0_48 = arith.constant 0 : index
    %63 = vector.load %arg18[%c0_46, %c0_47, %c0_48] : memref<1x8x128xf32, #tpu.memory_space<vmem>>, vector<1x8x128xf32>
    %64 = vector.shape_cast %63 : vector<1x8x128xf32> to vector<8x128xf32>
    %65 = vector.shape_cast %62 : vector<8x128xf32> to vector<1x8x128xf32>
    tpu.vector_store %arg18[%c0_46, %c0_47, %c0_48], %65 {strides = array<i32>} : memref<1x8x128xf32, #tpu.memory_space<vmem>>, vector<1x8x128xf32>,
    %c3_i32 = arith.constant 3 : i32
    %66 = arith.cmpi eq, %arg1, %c3_i32 : i32
    %67 = arith.extui %66 : i1 to i32
    %c0_i32_49 = arith.constant 0 : i32
    %68 = arith.cmpi ne, %67, %c0_i32_49 : i32
    scf.if %68 {
      %c0_50 = arith.constant 0 : index
      %c0_51 = arith.constant 0 : index
      %69 = vector.load %arg19[%c0_50, %c0_51] : memref<8x64xf32, #tpu.memory_space<vmem>>, vector<8x64xf32>
      tpu.vector_store %arg19[%c0_50, %c0_51], %56 {strides = array<i32>} : memref<8x64xf32, #tpu.memory_space<vmem>>, vector<8x64xf32>,
    } else {
    }
    return
  }
  func.func @transform_0(%arg0: i32, %arg1: i32) -> (i32, i32, i32) {
    %c0_i32 = arith.constant 0 : i32
    %c0_i32_0 = arith.constant 0 : i32
    return %arg1, %arg0, %c0_i32 : i32, i32, i32
  }
  func.func @transform_1(%arg0: i32, %arg1: i32) -> (i32, i32) {
    %c0_i32 = arith.constant 0 : i32
    %c0_i32_0 = arith.constant 0 : i32
    return %arg0, %c0_i32 : i32, i32
  }
  func.func @transform_2(%arg0: i32, %arg1: i32) -> (i32, i32) {
    %c0_i32 = arith.constant 0 : i32
    %c0_i32_0 = arith.constant 0 : i32
    %c0_i32_1 = arith.constant 0 : i32
    return %c0_i32, %c0_i32_0 : i32, i32
  }
  func.func @transform_3(%arg0: i32, %arg1: i32) -> (i32, i32) {
    %c0_i32 = arith.constant 0 : i32
    %c0_i32_0 = arith.constant 0 : i32
    %c0_i32_1 = arith.constant 0 : i32
    return %c0_i32, %c0_i32_0 : i32, i32
  }
  func.func @transform_4(%arg0: i32, %arg1: i32) -> (i32, i32) {
    %c0_i32 = arith.constant 0 : i32
    %c0_i32_0 = arith.constant 0 : i32
    %c0_i32_1 = arith.constant 0 : i32
    return %c0_i32, %c0_i32_0 : i32, i32
  }
  func.func @transform_5(%arg0: i32, %arg1: i32) -> (i32, i32) {
    %c0_i32 = arith.constant 0 : i32
    %c0_i32_0 = arith.constant 0 : i32
    %c0_i32_1 = arith.constant 0 : i32
    return %c0_i32, %c0_i32_0 : i32, i32
  }
  func.func @transform_6(%arg0: i32, %arg1: i32) -> (i32, i32) {
    %c0_i32 = arith.constant 0 : i32
    %c0_i32_0 = arith.constant 0 : i32
    %c0_i32_1 = arith.constant 0 : i32
    return %c0_i32, %c0_i32_0 : i32, i32
  }
  func.func @transform_7(%arg0: i32, %arg1: i32) -> (i32, i32) {
    %c0_i32 = arith.constant 0 : i32
    %c0_i32_0 = arith.constant 0 : i32
    %c0_i32_1 = arith.constant 0 : i32
    return %c0_i32, %c0_i32_0 : i32, i32
  }
  func.func @transform_8(%arg0: i32, %arg1: i32) -> (i32, i32) {
    %c0_i32 = arith.constant 0 : i32
    %c0_i32_0 = arith.constant 0 : i32
    %c0_i32_1 = arith.constant 0 : i32
    return %c0_i32, %c0_i32_0 : i32, i32
  }
  func.func @transform_9(%arg0: i32, %arg1: i32) -> (i32, i32) {
    %c0_i32 = arith.constant 0 : i32
    %c0_i32_0 = arith.constant 0 : i32
    %c0_i32_1 = arith.constant 0 : i32
    return %c0_i32, %c0_i32_0 : i32, i32
  }
  func.func @transform_10(%arg0: i32, %arg1: i32) -> (i32, i32) {
    %c0_i32 = arith.constant 0 : i32
    %c0_i32_0 = arith.constant 0 : i32
    %c0_i32_1 = arith.constant 0 : i32
    return %c0_i32, %c0_i32_0 : i32, i32
  }
  func.func @transform_11(%arg0: i32, %arg1: i32) -> (i32, i32) {
    %c0_i32 = arith.constant 0 : i32
    %c0_i32_0 = arith.constant 0 : i32
    %c0_i32_1 = arith.constant 0 : i32
    return %c0_i32, %c0_i32_0 : i32, i32
  }
  func.func @transform_12(%arg0: i32, %arg1: i32) -> (i32, i32) {
    %c0_i32 = arith.constant 0 : i32
    %c0_i32_0 = arith.constant 0 : i32
    %c0_i32_1 = arith.constant 0 : i32
    return %c0_i32, %c0_i32_0 : i32, i32
  }
  func.func @transform_13(%arg0: i32, %arg1: i32) -> (i32, i32) {
    %c0_i32 = arith.constant 0 : i32
    %c0_i32_0 = arith.constant 0 : i32
    %c0_i32_1 = arith.constant 0 : i32
    return %c0_i32, %c0_i32_0 : i32, i32
  }
  func.func @transform_14(%arg0: i32, %arg1: i32) -> (i32, i32) {
    %c0_i32 = arith.constant 0 : i32
    %c0_i32_0 = arith.constant 0 : i32
    %c0_i32_1 = arith.constant 0 : i32
    return %c0_i32, %c0_i32_0 : i32, i32
  }
  func.func @transform_15(%arg0: i32, %arg1: i32) -> (i32, i32) {
    %c0_i32 = arith.constant 0 : i32
    %c0_i32_0 = arith.constant 0 : i32
    %c0_i32_1 = arith.constant 0 : i32
    return %c0_i32, %c0_i32_0 : i32, i32
  }
  func.func @transform_16(%arg0: i32, %arg1: i32) -> (i32, i32, i32) {
    %c0_i32 = arith.constant 0 : i32
    %c0_i32_0 = arith.constant 0 : i32
    return %arg1, %arg0, %c0_i32 : i32, i32, i32
  }
  func.func @transform_17(%arg0: i32, %arg1: i32) -> (i32, i32) {
    %c0_i32 = arith.constant 0 : i32
    %c0_i32_0 = arith.constant 0 : i32
    return %arg0, %c0_i32 : i32, i32
  }
}

</mosaic_0001>

<bundles_post_ra>
// kernel: tpu_custom_call.1
= control target key start
LH: loop header
LB: loop body
LE: loop exit
PB: predicated region body
PF: predicated region fallthrough
CT: control target
= control target key end

     0   :  { %s3217_s0 = inlined_call_operand.hbm [shape: f32[4,8,32], index: 0, kind: input, shape index: {}]   ;;  %s3218_s1 = inlined_call_operand.hbm [shape: f32[8,64], index: 1, kind: input, shape index: {}]   ;;  %s3219_s2 = inlined_call_operand.hbm [shape: f32[32,64], index: 2, kind: input, shape index: {}]   ;;  %s3220_s3 = inlined_call_operand.vmem [shape: f32[1,64], index: 3, kind: input, shape index: {}]   ;;  %s3221_s4 = inlined_call_operand.hbm [shape: f32[64,64], index: 4, kind: input, shape index: {}]   ;;  %s3222_s5 = inlined_call_operand.hbm [shape: f32[64,64], index: 5, kind: input, shape index: {}]   ;;  %s3223_s6 = inlined_call_operand.hbm [shape: f32[64,64], index: 6, kind: input, shape index: {}]   ;;  %s3224_s7 = inlined_call_operand.hbm [shape: f32[64,64], index: 7, kind: input, shape index: {}]   ;;  %s3225_s8 = inlined_call_operand.hbm [shape: f32[64,64], index: 8, kind: input, shape index: {}]   ;;  %s3226_s9 = inlined_call_operand.hbm [shape: f32[64,64], index: 9, kind: input, shape index: {}]   ;;  %s3227_s10 = inlined_call_operand.vmem [shape: f32[1,64], index: 10, kind: input, shape index: {}]   ;;  %s3228_s11 = inlined_call_operand.vmem [shape: f32[1,64], index: 11, kind: input, shape index: {}]   ;;  %s3229_s12 = inlined_call_operand.vmem [shape: f32[1,64], index: 12, kind: input, shape index: {}]   ;;  %s3230_s13 = inlined_call_operand.vmem [shape: f32[1,64], index: 13, kind: input, shape index: {}]   ;;  %s3231_s14 = inlined_call_operand.hbm [shape: f32[64,128], index: 14, kind: input, shape index: {}]   ;;  %s3232_s15 = inlined_call_operand.vmem [shape: f32[1,128], index: 15, kind: input, shape index: {}]   ;;  %s3233_s16 = inlined_call_operand.hbm [shape: f32[4,8,128], index: 16, kind: output, shape index: {0}]   ;;  %s3234_s17 = inlined_call_operand.hbm [shape: f32[8,64], index: 17, kind: output, shape index: {1}]  }
   0x1   :  { %3247 = sst [smem:[#allocation32_spill]] %s3217_s0 }
   0x2   :  { %3248 = sst [smem:[#allocation33_spill]] %s3218_s1 }
   0x3   :  { %3249 = sst [smem:[#allocation34_spill]] %s3219_s2 }
   0x4   :  { %3250 = sst [smem:[#allocation35_spill]] %s3220_s3 }
   0x5   :  { %3251 = sst [smem:[#allocation36_spill]] %s3221_s4 }
   0x6   :  { %3252 = sst [smem:[#allocation37_spill]] %s3222_s5 }
   0x7   :  { %3253 = sst [smem:[#allocation38_spill]] %s3227_s10 }
   0x8   :  { %3254 = sst [smem:[#allocation39_spill]] %s3228_s11 }
   0x9   :  { %3255 = sst [smem:[#allocation40_spill]] %s3229_s12 }
   0xa   :  { %3256 = sst [smem:[#allocation41_spill]] %s3230_s13 }
   0xb   :  { %3257 = sst [smem:[#allocation42_spill]] %s3232_s15 }
   0xc   :  { %3258 = sst [smem:[#allocation43_spill]] %s3233_s16 }
   0xd   :  { %3259 = sst [smem:[#allocation44_spill]] %s3234_s17 }
   0xe   :  { %23 = vsyncpa [#allocation4], 0 }
   0xf   :  { %25 = vsyncpa [#allocation4 + $0x1], 0 }
  0x10   :  { %26 = vsyncpa [#allocation7], 0 }
  0x11   :  { %27 = vsyncpa [#allocation10], 0 }
  0x12   :  { %28 = vsyncpa [#allocation13], 0 }
  0x13   :  { %29 = vsyncpa [#allocation16], 0 }
  0x14   :  { %30 = vsyncpa [#allocation19], 0 }
  0x15   :  { %31 = vsyncpa [#allocation5], 0 }
  0x16   :  { %33 = vsyncpa [#allocation5 + $0x1], 0 }
  0x17   :  { %34 = vsyncpa [#allocation22], 0  ;;  %s2695_s24 = smov 0   ;;  %s2697_s25 = smov 0  }
  0x18   :  { %s2699_s26 = smov 0   ;;  %s2701_s27 = smov 0  }
  0x19   :  { %s2703_s28 = smov 0   ;;  %s2705_s29 = smov 0  }
  0x1a LB: > { %3260 = sst [smem:[#allocation31_spill]] %s2578_s27  ;;  %s3237_s0 = sadd.s32 4294967295, %s2586_s29   ;;  %s2586_s29 = sphi %s2705_s29, %s40_s29   ;;  %s2582_s28 = sphi %s2703_s28, %s3298_s28   ;;  %s2578_s27 = sphi %s2701_s27, %s3297_s27   ;;  %s2574_s26 = sphi %s2699_s26, %s3296_s26   ;;  %s2570_s25 = sphi %s2697_s25, %s3295_s25   ;;  %s2566_s24 = sphi %s2695_s24, %s3294_s24  }
  0x1b   : > { %p1646_p0 = scmp.ge.s32.totalorder %s2586_s29, 1  ;;  %p2729_p1 = scmp.eq.s32.totalorder %s3237_s0, 0 }
  0x1c   : > { %p459_p2 = scmp.lt.s32.totalorder %s2586_s29, 5  ;;  %s2588_s19 = smov [#allocation6]  }
  0x1d   : > { %s3261_s30 = scalar_select %p2729_p1, 1, 0 }
  0x1e   : > { %p2734_p3 = pnand %p1646_p0, %p459_p2  ;;  %s474_s1 = sshll.u32 %s2588_s19, 4  ;;  %s475_s1 = int_to_ptr.vmem [resolvable:$true] %s474_s1 }
  0x1f   : > { %s2589_s21 = smov [#allocation9]   ;;  %s2590_s23 = smov [#allocation12]  }
  0x20   : > { %s3262_s18 = scalar_select %p2734_p3, 1, 0 }
  0x21   : > { %p2041_p4 = pneg %p2734_p3  ;;  %s500_s22 = sshll.u32 %s2589_s21, 4  ;;  %s2746_s22 = int_to_ptr.vmem [resolvable:$true] %s500_s22 }
  0x22   : > { %s2748_s0 = sshll.u32 %s2590_s23, 4  ;;  %s3264_s15 = sld [smem:[#allocation33_spill]]  ;;  %s527_s0 = int_to_ptr.vmem [resolvable:$true] %s2748_s0 }
  0x23   : > { %p2742_p5 = pnand %p2041_p4, %p2729_p1 }
  0x25   : > { %p2758_p7 = pneg %p2742_p5 }
  0x28   : > { %s2172_s19 = scalar_lea.hbm %s3264_s15, 128 }
  0x29   : > { %p2173_p6 = scmp.ne.s32.totalorder %s3264_s15, %s2172_s19  ;;  %p2179_p10 = scmp.lt.u32.totalorder %s2172_s19, %s3264_s15 }
  0x2b   : > { %p2175_p8 = pnand %p2758_p7, %p2173_p6 }
  0x2d   : > { %p2176_p9 = pneg %p2175_p8 }
  0x2f   : > { %p2181_p11 = pnand %p2179_p10, %p2176_p9 }
  0x31   : > { %2184 = shalt.err (!%p2181_p11)
}
  0x32   : > { %s2185_s16 = scalar_lea.vmem %s475_s1, 128  ;;  %p2193_p2 = scmp.lt.s32.totalorder %s475_s1, %s475_s1 }
  0x33   : > { %p2186_p12 = scmp.ne.s32.totalorder %s475_s1, %s2185_s16  ;;  %p2194_p4 = scmp.lt.s32.totalorder %s2185_s16, %s2185_s16 }
  0x35   : > { %p2188_p13 = pnand %p2186_p12, %p2758_p7  ;;  %p2195_p3 = por %p2194_p4, %p2193_p2 }
  0x37   : > { %p2189_p0 = pneg %p2188_p13 }
  0x39   : > { %p2196_p1 = pnand %p2195_p3, %p2189_p0 }
  0x3b   : > { %2199 = shalt.err (!%p2196_p1)
}
  0x3c   : > { %2044 = dma.hbm_to_vmem [thread:$0]  (!%p2742_p5), %s3264_s15, 128, %s475_s1, [#allocation7]  }
  0x3d   : > { %s3266_s4 = sld [smem:[#allocation36_spill]] }
  0x43   : > { %s2200_s21 = scalar_lea.hbm %s3266_s4, 1024 }
  0x44   : > { %p2201_p6 = scmp.ne.s32.totalorder %s3266_s4, %s2200_s21  ;;  %p2207_p1 = scmp.lt.u32.totalorder %s2200_s21, %s3266_s4 }
  0x46   : > { %p2203_p8 = pnand %p2201_p6, %p2758_p7 }
  0x48   : > { %p2204_p9 = pneg %p2203_p8 }
  0x4a   : > { %p2209_p3 = pnand %p2207_p1, %p2204_p9 }
  0x4c   : > { %2212 = shalt.err (!%p2209_p3)
}
  0x4d   : > { %s2213_s1 = scalar_lea.vmem %s2746_s22, 1024  ;;  %p2221_p13 = scmp.lt.s32.totalorder %s2746_s22, %s2746_s22 }
  0x4e   : > { %p2214_p10 = scmp.ne.s32.totalorder %s2746_s22, %s2213_s1  ;;  %p2222_p0 = scmp.lt.s32.totalorder %s2213_s1, %s2213_s1 }
  0x50   : > { %p2216_p11 = pnand %p2214_p10, %p2758_p7  ;;  %p2223_p2 = por %p2222_p0, %p2221_p13 }
  0x52   : > { %p2217_p12 = pneg %p2216_p11 }
  0x54   : > { %p2224_p4 = pnand %p2223_p2, %p2217_p12 }
  0x56   : > { %2227 = shalt.err (!%p2224_p4)
}
  0x57   : > { %s2591_s10 = smov 128   ;;  %s2592_s3 = smov 8  }
  0x58   : > { %2050 = dma.hbm_to_vmem [thread:$0]  (!%p2742_p5), %s3266_s4, 1024, %s2746_s22, [#allocation10], %s2591_s10, %s2591_s10, %s2592_s3  }
  0x59   : > { %s2228_s21 = scalar_lea.hbm %s3223_s6, 1024 }
  0x5a   : > { %p2229_p6 = scmp.ne.s32.totalorder %s3223_s6, %s2228_s21  ;;  %p2235_p1 = scmp.lt.u32.totalorder %s2228_s21, %s3223_s6 }
  0x5c   : > { %p2231_p8 = pnand %p2229_p6, %p2758_p7 }
  0x5e   : > { %p2232_p9 = pneg %p2231_p8 }
  0x60   : > { %p2237_p3 = pnand %p2235_p1, %p2232_p9 }
  0x62   : > { %2240 = shalt.err (!%p2237_p3)
}
  0x63   : > { %s2241_s12 = scalar_lea.vmem %s527_s0, 1024  ;;  %p2249_p13 = scmp.lt.s32.totalorder %s527_s0, %s527_s0 }
  0x64   : > { %p2242_p10 = scmp.ne.s32.totalorder %s527_s0, %s2241_s12  ;;  %p2250_p0 = scmp.lt.s32.totalorder %s2241_s12, %s2241_s12 }
  0x66   : > { %p2244_p11 = pnand %p2242_p10, %p2758_p7  ;;  %p2251_p2 = por %p2250_p0, %p2249_p13 }
  0x68   : > { %p2245_p12 = pneg %p2244_p11 }
  0x6a   : > { %p2252_p4 = pnand %p2251_p2, %p2245_p12 }
  0x6c   : > { %2255 = shalt.err (!%p2252_p4)
}
  0x6d   : > { %2056 = dma.hbm_to_vmem [thread:$0]  (!%p2742_p5), %s3223_s6, 1024, %s527_s0, [#allocation13], %s2591_s10, %s2591_s10, %s2592_s3  }
  0x6e   : > { %s2593_s13 = smov [#allocation15]   ;;  %s2594_s19 = smov [#allocation8]  }
  0x6f   : > { %s552_s17 = sshll.u32 %s2593_s13, 4  ;;  %s484_s21 = sshll.u32 %s2594_s19, 4  ;;  %s553_s17 = int_to_ptr.vmem [resolvable:$true] %s552_s17  ;;  %s485_s21 = int_to_ptr.vmem [resolvable:$true] %s484_s21 }
  0x70   : > { %s2256_s1 = scalar_lea.hbm %s3225_s8, 1024 }
  0x71   : > { %p2257_p6 = scmp.ne.s32.totalorder %s3225_s8, %s2256_s1  ;;  %p2263_p1 = scmp.lt.u32.totalorder %s2256_s1, %s3225_s8 }
  0x73   : > { %p2259_p8 = pnand %p2257_p6, %p2758_p7 }
  0x75   : > { %p2260_p9 = pneg %p2259_p8 }
  0x77   : > { %p2265_p3 = pnand %p2263_p1, %p2260_p9 }
  0x79   : > { %2268 = shalt.err (!%p2265_p3)
}
  0x7a   : > { %s2269_s0 = scalar_lea.vmem %s553_s17, 1024  ;;  %p2277_p13 = scmp.lt.s32.totalorder %s553_s17, %s553_s17 }
  0x7b   : > { %p2270_p10 = scmp.ne.s32.totalorder %s553_s17, %s2269_s0  ;;  %p2278_p0 = scmp.lt.s32.totalorder %s2269_s0, %s2269_s0 }
  0x7d   : > { %p2272_p11 = pnand %p2270_p10, %p2758_p7  ;;  %p2279_p2 = por %p2278_p0, %p2277_p13 }
  0x7f   : > { %p2273_p12 = pneg %p2272_p11 }
  0x81   : > { %p2280_p4 = pnand %p2279_p2, %p2273_p12 }
  0x83   : > { %2283 = shalt.err (!%p2280_p4)
}
  0x84   : > { %2062 = dma.hbm_to_vmem [thread:$0]  (!%p2742_p5), %s3225_s8, 1024, %s553_s17, [#allocation16], %s2591_s10, %s2591_s10, %s2592_s3  }
  0x85   : > { %s3267_s2 = sld [smem:[#allocation34_spill]] }
  0x8b   : > { %s2284_s19 = scalar_lea.hbm %s3267_s2, 512 }
  0x8c   : > { %p2285_p6 = scmp.ne.s32.totalorder %s3267_s2, %s2284_s19  ;;  %p2291_p1 = scmp.lt.u32.totalorder %s2284_s19, %s3267_s2 }
  0x8e   : > { %p2287_p8 = pnand %p2285_p6, %p2758_p7 }
  0x90   : > { %p2288_p9 = pneg %p2287_p8 }
  0x92   : > { %p2293_p3 = pnand %p2291_p1, %p2288_p9 }
  0x94   : > { %2296 = shalt.err (!%p2293_p3)
}
  0x95   : > { %s2297_s15 = scalar_lea.vmem %s485_s21, 512  ;;  %p2305_p13 = scmp.lt.s32.totalorder %s485_s21, %s485_s21 }
  0x96   : > { %p2298_p10 = scmp.ne.s32.totalorder %s485_s21, %s2297_s15  ;;  %p2306_p0 = scmp.lt.s32.totalorder %s2297_s15, %s2297_s15 }
  0x98   : > { %p2300_p11 = pnand %p2298_p10, %p2758_p7  ;;  %p2307_p2 = por %p2306_p0, %p2305_p13 }
  0x9a   : > { %p2301_p12 = pneg %p2300_p11 }
  0x9c   : > { %p2308_p4 = pnand %p2307_p2, %p2301_p12 }
  0x9e   : > { %2311 = shalt.err (!%p2308_p4)
}
  0x9f   : > { %2047 = dma.hbm_to_vmem [thread:$0]  (!%p2742_p5), %s3267_s2, 512, %s485_s21, [#allocation7], %s2591_s10, %s2591_s10, %s2592_s3  }
  0xa0   : > { %s2595_s4 = smov [#allocation11]   ;;  %s2596_s22 = smov [#allocation14]  }
  0xa1   : > { %s513_s27 = sshll.u32 %s2595_s4, 4  ;;  %s539_s13 = sshll.u32 %s2596_s22, 4  ;;  %s514_s27 = int_to_ptr.vmem [resolvable:$true] %s513_s27  ;;  %s540_s13 = int_to_ptr.vmem [resolvable:$true] %s539_s13 }
  0xa2   : > { %s3268_s5 = sld [smem:[#allocation37_spill]] }
  0xa8   : > { %s2312_s16 = scalar_lea.hbm %s3268_s5, 1024 }
  0xa9   : > { %p2313_p6 = scmp.ne.s32.totalorder %s3268_s5, %s2312_s16  ;;  %p2319_p1 = scmp.lt.u32.totalorder %s2312_s16, %s3268_s5 }
  0xab   : > { %p2315_p8 = pnand %p2313_p6, %p2758_p7 }
  0xad   : > { %p2316_p9 = pneg %p2315_p8 }
  0xaf   : > { %p2321_p3 = pnand %p2319_p1, %p2316_p9 }
  0xb1   : > { %2324 = shalt.err (!%p2321_p3)
}
  0xb2   : > { %s2325_s21 = scalar_lea.vmem %s514_s27, 1024  ;;  %p2333_p13 = scmp.lt.s32.totalorder %s514_s27, %s514_s27 }
  0xb3   : > { %p2326_p10 = scmp.ne.s32.totalorder %s514_s27, %s2325_s21  ;;  %p2334_p0 = scmp.lt.s32.totalorder %s2325_s21, %s2325_s21 }
  0xb5   : > { %p2328_p11 = pnand %p2326_p10, %p2758_p7  ;;  %p2335_p2 = por %p2334_p0, %p2333_p13 }
  0xb7   : > { %p2329_p12 = pneg %p2328_p11 }
  0xb9   : > { %p2336_p4 = pnand %p2335_p2, %p2329_p12 }
  0xbb   : > { %2339 = shalt.err (!%p2336_p4)
}
  0xbc   : > { %2053 = dma.hbm_to_vmem [thread:$0]  (!%p2742_p5), %s3268_s5, 1024, %s514_s27, [#allocation10], %s2591_s10, %s2591_s10, %s2592_s3  }
  0xbd   : > { %s2340_s23 = scalar_lea.hbm %s3224_s7, 1024 }
  0xbe   : > { %p2341_p6 = scmp.ne.s32.totalorder %s3224_s7, %s2340_s23  ;;  %p2347_p1 = scmp.lt.u32.totalorder %s2340_s23, %s3224_s7 }
  0xc0   : > { %p2343_p8 = pnand %p2341_p6, %p2758_p7 }
  0xc2   : > { %p2344_p9 = pneg %p2343_p8 }
  0xc4   : > { %p2349_p3 = pnand %p2347_p1, %p2344_p9 }
  0xc6   : > { %2352 = shalt.err (!%p2349_p3)
}
  0xc7   : > { %s2353_s17 = scalar_lea.vmem %s540_s13, 1024  ;;  %p2361_p13 = scmp.lt.s32.totalorder %s540_s13, %s540_s13 }
  0xc8   : > { %p2354_p10 = scmp.ne.s32.totalorder %s540_s13, %s2353_s17  ;;  %p2362_p0 = scmp.lt.s32.totalorder %s2353_s17, %s2353_s17 }
  0xca   : > { %p2356_p11 = pnand %p2354_p10, %p2758_p7  ;;  %p2363_p2 = por %p2362_p0, %p2361_p13 }
  0xcc   : > { %p2357_p12 = pneg %p2356_p11 }
  0xce   : > { %p2364_p4 = pnand %p2363_p2, %p2357_p12 }
  0xd0   : > { %2367 = shalt.err (!%p2364_p4)
}
  0xd1   : > { %2059 = dma.hbm_to_vmem [thread:$0]  (!%p2742_p5), %s3224_s7, 1024, %s540_s13, [#allocation13], %s2591_s10, %s2591_s10, %s2592_s3  }
  0xd2   : > { %s2597_s0 = smov [#allocation17]   ;;  %s2598_s22 = smov [#allocation18]  }
  0xd3   : > { %s565_s4 = sshll.u32 %s2597_s0, 4  ;;  %s590_s19 = sshll.u32 %s2598_s22, 4  ;;  %s566_s4 = int_to_ptr.vmem [resolvable:$true] %s565_s4  ;;  %s591_s19 = int_to_ptr.vmem [resolvable:$true] %s590_s19 }
  0xd4   : > { %s2368_s1 = scalar_lea.hbm %s3226_s9, 1024 }
  0xd5   : > { %p2369_p6 = scmp.ne.s32.totalorder %s3226_s9, %s2368_s1  ;;  %p2375_p1 = scmp.lt.u32.totalorder %s2368_s1, %s3226_s9 }
  0xd7   : > { %p2371_p8 = pnand %p2369_p6, %p2758_p7 }
  0xd9   : > { %p2372_p9 = pneg %p2371_p8 }
  0xdb   : > { %p2377_p3 = pnand %p2375_p1, %p2372_p9 }
  0xdd   : > { %2380 = shalt.err (!%p2377_p3)
}
  0xde   : > { %s2381_s13 = scalar_lea.vmem %s566_s4, 1024  ;;  %p2389_p13 = scmp.lt.s32.totalorder %s566_s4, %s566_s4 }
  0xdf   : > { %p2382_p10 = scmp.ne.s32.totalorder %s566_s4, %s2381_s13  ;;  %p2390_p0 = scmp.lt.s32.totalorder %s2381_s13, %s2381_s13 }
  0xe1   : > { %p2384_p11 = pnand %p2382_p10, %p2758_p7  ;;  %p2391_p2 = por %p2390_p0, %p2389_p13 }
  0xe3   : > { %p2385_p12 = pneg %p2384_p11 }
  0xe5   : > { %p2392_p4 = pnand %p2391_p2, %p2385_p12 }
  0xe7   : > { %2395 = shalt.err (!%p2392_p4)
}
  0xe8   : > { %2065 = dma.hbm_to_vmem [thread:$0]  (!%p2742_p5), %s3226_s9, 1024, %s566_s4, [#allocation16], %s2591_s10, %s2591_s10, %s2592_s3  }
  0xe9   : > { %s2396_s16 = scalar_lea.hbm %s3231_s14, 1024 }
  0xea   : > { %p2397_p6 = scmp.ne.s32.totalorder %s3231_s14, %s2396_s16  ;;  %p2403_p1 = scmp.lt.u32.totalorder %s2396_s16, %s3231_s14 }
  0xec   : > { %p2399_p8 = pnand %p2397_p6, %p2758_p7 }
  0xee   : > { %p2400_p9 = pneg %p2399_p8 }
  0xf0   : > { %p2405_p3 = pnand %p2403_p1, %p2400_p9 }
  0xf2   : > { %2408 = shalt.err (!%p2405_p3)
}
  0xf3   : > { %s2409_s27 = scalar_lea.vmem %s591_s19, 1024  ;;  %p2417_p13 = scmp.lt.s32.totalorder %s591_s19, %s591_s19 }
  0xf4   : > { %p2410_p10 = scmp.ne.s32.totalorder %s591_s19, %s2409_s27  ;;  %p2418_p0 = scmp.lt.s32.totalorder %s2409_s27, %s2409_s27 }
  0xf6   : > { %p2412_p11 = pnand %p2410_p10, %p2758_p7  ;;  %p2419_p2 = por %p2418_p0, %p2417_p13 }
  0xf8   : > { %p2413_p12 = pneg %p2412_p11 }
  0xfa   : > { %p2420_p4 = pnand %p2419_p2, %p2413_p12 }
  0xfc   : > { %2423 = shalt.err (!%p2420_p4)
}
  0xfd   : > { %2068 = dma.hbm_to_vmem [thread:$0]  (!%p2742_p5), %s3231_s14, 1024, %s591_s19, [#allocation19], %s2591_s10, %s2591_s10, %s2592_s3  }
  0xfe   : > { %s1645_s11 = sadd.s32 4294967294, %s2586_s29   ;;  %s49_s20 = sadd.s32 1, %s2582_s28 }
  0xff   : > { %s61_s21 = sadd.s32 1, %s2574_s26  ;;  %p50_p7 = scmp.ge.s32.totalorder %s49_s20, 4 }
 0x100   : > { %p68_p6 = scmp.ne.s32.totalorder %s2574_s26, %s2570_s25  ;;  %p69_p8 = scmp.eq.s32.totalorder %s2586_s29, 0 }
 0x101   : > { %p74_p9 = scmp.ne.s32.totalorder %s2570_s25, %s2566_s24  ;;  %s3300_s20 = smov (%p50_p7, %s49_s20), 0 }
 0x102   : > { %p2958_p1 = por %p69_p8, %p68_p6  ;;  %p3270_p3 = scmp.ne.s32.totalorder %s3261_s30, 0 }
 0x103   : > { %s56_s3 = ssub.s32 %s2582_s28, %s3300_s20  ;;  %s3272_s19 = sadd.s32 4294967295, %s2586_s29  }
 0x104   : > { %p2964_p5 = por %p3270_p3, %p74_p9  ;;  %p2972_p10 = scmp.eq.s32.totalorder %s3272_s19, 3 }
 0x105   : > { %p59_p11 = scmp.eq.s32.totalorder %s56_s3, 0  ;;  %p426_p12 = scmp.eq.s32.totalorder %s1645_s11, 3 }
 0x106   : > { %s3273_s22 = scalar_select %p2972_p10, 1, 0 }
 0x107   : > { %p2978_p13 = por %p2972_p10, %p68_p6  ;;  %p2086_p0 = scmp.lt.s32.totalorder %s2586_s29, 4 }
 0x108   : > { %s2984_s16 = scalar_select %p59_p11, %s2574_s26, %s61_s21  }
 0x109   : > { %s3274_s23 = scalar_select %p2978_p13, 1, 0 }
 0x10a   : > { %p2986_p2 = por %p426_p12, %p74_p9  ;;  %s607_s12 = sand.u32 1, %s2574_s26  }
 0x10b   : > { %s1657_s15 = sshll.u32 %s607_s12, 3  ;;  %s1658_s17 = sshll.u32 %s2582_s28, 7 }
 0x10c   : > { %s3275_s1 = scalar_select %p2986_p2, 1, 0 }
 0x10d   : > { %s3276_s13 = sld [smem:[#allocation32_spill]]  ;;  %s611_s11 = scalar_lea.vmem [#allocation3], %s1657_s15 }
 0x10e   : > { %s619_s19 = sshll.u32 %s611_s11, 4  ;;  %p3001_p4 = pnand %p2086_p0, %p2958_p1  ;;  %s2997_s19 = int_to_ptr.vmem [resolvable:$true] %s619_s19 }
 0x10f   : > { %s608_s2 = scalar_lea.sflag [#allocation4], %s607_s12 }
 0x110   : > { %p2426_p6 = pneg %p3001_p4 }
 0x113   : > { %s2995_s3 = scalar_lea.hbm %s3276_s13, %s1658_s17  ;;  %s2429_s27 = scalar_lea.hbm %s3276_s13, 512 }
 0x114   : > { %s2424_s5 = scalar_lea.hbm %s2995_s3, 128  ;;  %p2430_p1 = scmp.lt.u32.totalorder %s2995_s3, %s3276_s13 }
 0x115   : > { %p2425_p7 = scmp.ne.s32.totalorder %s2995_s3, %s2424_s5  ;;  %p2431_p3 = scmp.lt.u32.totalorder %s2429_s27, %s2424_s5 }
 0x116   : > { %p2433_p12 = scmp.lt.u32.totalorder %s2424_s5, %s2995_s3 }
 0x117   : > { %p2427_p8 = pnand %p2426_p6, %p2425_p7  ;;  %p2432_p11 = por %p2431_p3, %p2430_p1 }
 0x119   : > { %p2428_p9 = pneg %p2427_p8  ;;  %p2434_p0 = por %p2433_p12, %p2432_p11 }
 0x11b   : > { %p2435_p2 = pnand %p2434_p0, %p2428_p9 }
 0x11d   : > { %2438 = shalt.err (!%p2435_p2)
}
 0x11e   : > { %s2439_s12 = scalar_lea.vmem %s2997_s19, 128  ;;  %s2599_s11 = smov [#allocation3]  }
 0x11f   : > { %p2440_p7 = scmp.ne.s32.totalorder %s2997_s19, %s2439_s12  ;;  %s2444_s15 = sshll.u32 %s2599_s11, 4  ;;  %s2445_s15 = int_to_ptr.vmem [resolvable:$false] %s2444_s15 }
 0x120   : > { %s2446_s17 = scalar_lea.vmem %s2445_s15, 256  ;;  %p2447_p13 = scmp.lt.s32.totalorder %s2997_s19, %s2445_s15 }
 0x121   : > { %p2442_p8 = pnand %p2440_p7, %p2426_p6  ;;  %p2448_p1 = scmp.lt.s32.totalorder %s2446_s17, %s2439_s12 }
 0x123   : > { %p2443_p10 = pneg %p2442_p8  ;;  %p2449_p3 = por %p2448_p1, %p2447_p13 }
 0x125   : > { %p2450_p11 = pnand %p2449_p3, %p2443_p10 }
 0x127   : > { %2453 = shalt.err (!%p2450_p11)
}
 0x128   : > { %2072 = dma.hbm_to_vmem [thread:$0]  (!%p3001_p4), %s2995_s3, 128, %s2997_s19, %s608_s2  }
 0x129   : > { %p3278_p2 = scmp.ne.s32.totalorder %s3262_s18, 0 }
 0x12a   : > { %s3033_s5 = sand.u32 (!%p3278_p2), 1, %s2570_s25  }
 0x12b   : > { %628 = sbr.rel (%p3278_p2) target bundleno = 1097 (0x449), region = 84  ;;  %s1660_s27 = sshll.u32 (!%p3278_p2), %s3033_s5, 3 }
 0x12c   : > { %s631_s0 = scalar_lea.sflag (!%p3278_p2), [#allocation4], %s3033_s5  ;;  %s3037_s4 = scalar_lea.vmem (!%p3278_p2), [#allocation3], %s1660_s27 }
 0x132   : > { %2533 = dma.done.wait (%p2964_p5), %s631_s0, 128  }
 0x133   : > { %2535 = vsyncadd (%p2964_p5), %s631_s0, 4294967168  ;;  %p3279_p10 = scmp.ne.s32.totalorder %s3261_s30, 0 }
 0x135   : > { %2537 = dma.done.wait (%p3279_p10), [#allocation7], 640  }
 0x136   : > { %2539 = vsyncadd (%p3279_p10), [#allocation7], 4294966656 }
 0x137   : > { %2541 = dma.done.wait (%p3279_p10), [#allocation10], 2048  }
 0x138   : > { %2543 = vsyncadd (%p3279_p10), [#allocation10], 4294965248 }
 0x139   : > { %2545 = dma.done.wait (%p3279_p10), [#allocation13], 2048  }
 0x13a   : > { %2547 = vsyncadd (%p3279_p10), [#allocation13], 4294965248 }
 0x13b   : > { %2549 = dma.done.wait (%p3279_p10), [#allocation16], 2048  }
 0x13c   : > { %2551 = vsyncadd (%p3279_p10), [#allocation16], 4294965248 }
 0x13d   : > { %2553 = dma.done.wait (%p3279_p10), [#allocation19], 1024  }
 0x13e   : > { %2555 = vsyncadd (%p3279_p10), [#allocation19], 4294966272  ;;  %s3063_s2 = scalar_lea.vmem [#allocation20], %s1660_s27  ;;  %s3280_s18 = sld [smem:[#allocation31_spill]] }
 0x144   : > { %p1671_p5 = scmp.ne.s32.totalorder %s3280_s18, 0 }
 0x145   : > { %v725_v0 = vld [vmem:[#allocation6] sm:$0xff] (!%p1671_p5)  ;;  %vm726_vm0 = vcmask (!%p1671_p5), 523264  }
 0x146   : > { %724 = sbr.rel (%p1671_p5) target bundleno = 333 (0x14d), region = 128  ;;  %727 = vst.msk [vmem:[#allocation2] sm:$0xff] (!%p1671_p5), %vm726_vm0, %v725_v0 }
 0x14d PF: > { %v730_v1 = vld [vmem:[#allocation8] sm:$0xff]  ;;  %v731_v2 = vld [vmem:[#allocation8 + $0x8] sm:$0xff]  ;;  %v732_v3 = vld [vmem:[#allocation8 + $0x10] sm:$0xff]  ;;  %v2600_v4 = vmov 0.0|0.0   ;;  %vm2601_vm1 = vmmov 0   ;;  %v2602_v7 = vmov 0.0  }
 0x14e   : > { %1907 = vmatprep.subr.bf16.mxu0 %v2600_v4  ;;  %v1908_v5 = vpack.c.bf16 %v731_v2, %v730_v1  ;;  %v733_v6 = vld [vmem:[#allocation8 + $0x18] sm:$0xff]  ;;  %1771 = vmatprep.mubr.msk.f32.mxu0 %vm2601_vm1, %v2602_v7  ;;  %v824_v8 = vld [vmem:[#allocation14] sm:$0xff]  ;;  %v825_v9 = vld [vmem:[#allocation14 + $0x8] sm:$0xff]  ;;  %vm741_vm2 = vcmask 261120   ;;  %vm832_vm3 = vcmask 523264   ;;  %s3281_s3 = sld [smem:[#allocation35_spill]] }
 0x14f   : > { %1913 = vmatprep.subr.bf16.mxu1 %v2600_v4  ;;  %v826_v10 = vld [vmem:[#allocation14 + $0x10] sm:$0xff]  ;;  %v827_v11 = vld [vmem:[#allocation14 + $0x18] sm:$0xff]  ;;  %1790 = vmatprep.mubr.msk.f32.mxu1 %vm2601_vm1, %v2602_v7  ;;  %v1911_v12 = vpack.c.bf16 %v733_v6, %v732_v3  ;;  %v1914_v13 = vpack.c.bf16 %v825_v9, %v824_v8  ;;  %v828_v15 = vld [vmem:[#allocation14 + $0x20] sm:$0xff]  ;;  %s3282_s12 = sld [smem:[#allocation38_spill]]  ;;  %s3283_s17 = sld [smem:[#allocation39_spill]] }
 0x150   : > { %1909 = vmatpush3.bf16.msra.mxu0 %v1908_v5  ;;  %v1917_v14 = vpack.c.bf16 %v827_v11, %v826_v10  ;;  %v829_v16 = vld [vmem:[#allocation14 + $0x28] sm:$0xff]  ;;  %v816_v18 = vld [vmem:[#allocation9] sm:$0xff]  ;;  %v818_v21 = vld [vmem:[#allocation9 + $0x10] sm:$0xff]  ;;  %s3285_s10 = sld [smem:[#allocation40_spill]]  ;;  %s3286_s21 = sld [smem:[#allocation42_spill]] }
 0x151   : > { %1910 = vmatprep.subr.bf16.mxu0 %v2600_v4  ;;  %1915 = vmatpush3.bf16.msra.mxu1 %v1914_v13  ;;  %v729_v17 = vld [vmem:[%s3037_s4] sm:$0xff]  ;;  %v1920_v22 = vpack.c.bf16 %v829_v16, %v828_v15  ;;  %v819_v23 = vld [vmem:[#allocation9 + $0x18] sm:$0xff]  ;;  %v820_v27 = vld [vmem:[#allocation9 + $0x20] sm:$0xff]  ;;  %s3284_s4 = sld [smem:[#allocation41_spill]] }
 0x152   : > { %1916 = vmatprep.subr.bf16.mxu1 %v2600_v4  ;;  %v817_v19 = vld [vmem:[#allocation9 + $0x8] sm:$0xff]  ;;  %v830_v24 = vld [vmem:[#allocation14 + $0x30] sm:$0xff]  ;;  %v831_v25 = vld [vmem:[#allocation14 + $0x38] sm:$0xff]  ;;  %v1929_v26 = vpack.c.bf16 %v819_v23, %v818_v21 }
 0x153   : > { %v1926_v20 = vpack.c.bf16 %v817_v19, %v816_v18  ;;  %v821_v28 = vld [vmem:[#allocation9 + $0x28] sm:$0xff]  ;;  %v1923_v29 = vpack.c.bf16 %v831_v25, %v830_v24  ;;  %v1001_v30 = vld [vmem:[#allocation15] sm:$0xff]  ;;  %v1003_v35 = vld [vmem:[#allocation15 + $0x10] sm:$0xff] }
 0x154   : > { %1912 = vmatpush3.bf16.msra.mxu0 %v1911_v12  ;;  %v1002_v31 = vld [vmem:[#allocation15 + $0x8] sm:$0xff]  ;;  %v1932_v32 = vpack.c.bf16 %v821_v28, %v820_v27  ;;  %v3082_v33 = vld [vmem:[#allocation2] sm:$0xff]  ;;  %v1004_v36 = vld [vmem:[#allocation15 + $0x18] sm:$0xff] }
 0x155   : > { %1925 = vmatprep.subr.bf16.mxu0 %v2600_v4  ;;  %1918 = vmatpush3.bf16.msra.mxu1 %v1917_v14  ;;  %v1938_v34 = vpack.c.bf16 %v1002_v31, %v1001_v30  ;;  %v1941_v37 = vpack.c.bf16 %v1004_v36, %v1003_v35  ;;  %v1005_v38 = vld [vmem:[#allocation15 + $0x20] sm:$0xff]  ;;  %v1006_v39 = vld [vmem:[#allocation15 + $0x28] sm:$0xff]  ;;  %v1007_v41 = vld [vmem:[#allocation15 + $0x30] sm:$0xff] }
 0x156   : > { %1919 = vmatprep.subr.bf16.mxu1 %v2600_v4  ;;  %v1944_v40 = vpack.c.bf16 %v1006_v39, %v1005_v38  ;;  %v1008_v42 = vld [vmem:[#allocation15 + $0x38] sm:$0xff]  ;;  %v1163_v44 = vld [vmem:[#allocation12] sm:$0xff]  ;;  %v1164_v45 = vld [vmem:[#allocation12 + $0x8] sm:$0xff] }
 0x157   : > { %1772 = vmatmul.mubr.msk.f32.vlgmr.msra.gmra.mrb[0].mxu0 %vm741_vm2, %v729_v17  ;;  %v1947_v43 = vpack.c.bf16 %v1008_v42, %v1007_v41  ;;  %v1962_v46 = vpack.c.bf16 %v1164_v45, %v1163_v44  ;;  %v1165_v47 = vld [vmem:[#allocation12 + $0x10] sm:$0xff]  ;;  %v1166_v48 = vld [vmem:[#allocation12 + $0x18] sm:$0xff]  ;;  %v1167_v50 = vld [vmem:[#allocation12 + $0x20] sm:$0xff] }
 0x158   : > { %1927 = vmatpush3.bf16.msra.mxu0 %v1926_v20  ;;  %1809 = vmatprep.mubr.msk.f32.mxu0 %vm2601_vm1, %v2602_v7  ;;  %v1965_v49 = vpack.c.bf16 %v1166_v48, %v1165_v47  ;;  %v1168_v51 = vld [vmem:[#allocation12 + $0x28] sm:$0xff]  ;;  %v822_v53 = vld [vmem:[#allocation9 + $0x30] sm:$0xff]  ;;  %v823_v54 = vld [vmem:[#allocation9 + $0x38] sm:$0xff] }
 0x159   : > { %1928 = vmatprep.subr.bf16.mxu0 %v2600_v4  ;;  %1921 = vmatpush3.bf16.msra.mxu1 %v1920_v22  ;;  %v1968_v52 = vpack.c.bf16 %v1168_v51, %v1167_v50  ;;  %v1935_v55 = vpack.c.bf16 %v823_v54, %v822_v53  ;;  %v1169_v56 = vld [vmem:[#allocation12 + $0x30] sm:$0xff]  ;;  %v1170_v57 = vld [vmem:[#allocation12 + $0x38] sm:$0xff]  ;;  %v1672_v59 = vld [vmem:[%s3281_s3] ss:$0 sm:$0xff] }
 0x15a   : > { %1922 = vmatprep.subr.bf16.mxu1 %v2600_v4  ;;  %v1971_v58 = vpack.c.bf16 %v1170_v57, %v1169_v56  ;;  %v993_v60 = vld [vmem:[#allocation11] sm:$0xff]  ;;  %v994_v61 = vld [vmem:[#allocation11 + $0x8] sm:$0xff]  ;;  %v995_v3 = vld [vmem:[#allocation11 + $0x10] sm:$0xff] }
 0x15b   : > { %v1950_v1 = vpack.c.bf16 %v994_v61, %v993_v60  ;;  %v996_v5 = vld [vmem:[#allocation11 + $0x18] sm:$0xff]  ;;  %v997_v8 = vld [vmem:[#allocation11 + $0x20] sm:$0xff]  ;;  %v998_v9 = vld [vmem:[#allocation11 + $0x28] sm:$0xff] }
 0x15c   : > { %1930 = vmatpush3.bf16.msra.mxu0 %v1929_v26  ;;  %v1953_v6 = vpack.c.bf16 %v996_v5, %v995_v3  ;;  %v1956_v10 = vpack.c.bf16 %v998_v9, %v997_v8  ;;  %v999_v12 = vld [vmem:[#allocation11 + $0x30] sm:$0xff]  ;;  %v1000_v13 = vld [vmem:[#allocation11 + $0x38] sm:$0xff]  ;;  %v1248_v16 = vld [vmem:[#allocation17] sm:$0xff] }
 0x15d   : > { %1931 = vmatprep.subr.bf16.mxu0 %v2600_v4  ;;  %1924 = vmatpush3.bf16.msra.mxu1 %v1923_v29  ;;  %v1959_v15 = vpack.c.bf16 %v1000_v13, %v999_v12  ;;  %v1249_v17 = vld [vmem:[#allocation17 + $0x8] sm:$0xff]  ;;  %v1250_v19 = vld [vmem:[#allocation17 + $0x10] sm:$0xff]  ;;  %v1251_v20 = vld [vmem:[#allocation17 + $0x18] sm:$0xff] }
 0x15e   : > { %1937 = vmatprep.subr.bf16.mxu1 %v2600_v4  ;;  %v1974_v18 = vpack.c.bf16 %v1249_v17, %v1248_v16  ;;  %v1977_v21 = vpack.c.bf16 %v1251_v20, %v1250_v19  ;;  %v1252_v22 = vld [vmem:[#allocation17 + $0x20] sm:$0xff]  ;;  %v1253_v23 = vld [vmem:[#allocation17 + $0x28] sm:$0xff]  ;;  %v1254_v26 = vld [vmem:[#allocation17 + $0x30] sm:$0xff] }
 0x15f   : > { %v1980_v24 = vpack.c.bf16 %v1253_v23, %v1252_v22  ;;  %v1255_v27 = vld [vmem:[#allocation17 + $0x38] sm:$0xff]  ;;  %v1342_v30 = vld [vmem:[#allocation18 + $0x8] sm:$0xff]  ;;  %v1345_v36 = vld [vmem:[#allocation18 + $0x20] sm:$0xff] }
 0x160   : > { %1933 = vmatpush3.bf16.msra.mxu0 %v1932_v32  ;;  %1791 = vmatmul.mubr.msk.f32.vlgmr.msra.gmra.mrb[0].mxu1 %vm832_vm3, %v3082_v33  ;;  %v1983_v29 = vpack.c.bf16 %v1255_v27, %v1254_v26  ;;  %v1343_v32 = vld [vmem:[#allocation18 + $0x10] sm:$0xff]  ;;  %v1680_v51 = vld [vmem:[%s3283_s17] ss:$0 sm:$0xff] }
 0x161   : > { %1934 = vmatprep.subr.bf16.mxu0 %v2600_v4  ;;  %1939 = vmatpush3.bf16.msra.mxu1 %v1938_v34  ;;  %v1344_v34 = vld [vmem:[#allocation18 + $0x18] sm:$0xff]  ;;  %v1347_v39 = vld [vmem:[#allocation18 + $0x30] sm:$0xff]  ;;  %v1684_v57 = vld [vmem:[%s3284_s4] ss:$0 sm:$0xff] }
 0x162   : > { %1828 = vmatprep.mubr.msk.f32.mxu1 %vm2601_vm1, %v2602_v7  ;;  %1940 = vmatprep.subr.bf16.mxu1 %v2600_v4  ;;  %v1989_v35 = vpack.c.bf16 %v1344_v34, %v1343_v32  ;;  %v1686_v12 = vld [vmem:[%s3286_s21] ss:$0 sm:$0xff] }
 0x164   : > { %1936 = vmatpush3.bf16.msra.mxu0 %v1935_v55 }
 0x165   : > { %1942 = vmatpush3.bf16.msra.mxu1 %v1941_v37  ;;  %1949 = vmatprep.subr.bf16.mxu0 %v2600_v4  ;;  %v1346_v37 = vld [vmem:[#allocation18 + $0x28] sm:$0xff] }
 0x166   : > { %1943 = vmatprep.subr.bf16.mxu1 %v2600_v4  ;;  %v1992_v38 = vpack.c.bf16 %v1346_v37, %v1345_v36 }
 0x169   : > { %1945 = vmatpush3.bf16.msra.mxu1 %v1944_v40  ;;  %v1348_v40 = vld [vmem:[#allocation18 + $0x38] sm:$0xff] }
 0x16a   : > { %1946 = vmatprep.subr.bf16.mxu1 %v2600_v4  ;;  %v1995_v41 = vpack.c.bf16 %v1348_v40, %v1347_v39 }
 0x16d   : > { %1948 = vmatpush3.bf16.msra.mxu1 %v1947_v43  ;;  %v1676_v43 = vld [vmem:[%s3282_s12] ss:$0 sm:$0xff]  ;;  %s3287_s12 = sld [smem:[#allocation31_spill]] }
 0x16e   : > { %1961 = vmatprep.subr.bf16.mxu1 %v2600_v4 }
 0x170   : > { %1829 = vmatmul.mubr.msk.f32.vlgmr.msra.gmra.mrb[2].mxu1 %vm832_vm3, %v3082_v33 }
 0x171   : > { %1963 = vmatpush3.bf16.msra.mxu1 %v1962_v46  ;;  %1866 = vmatprep.mubr.msk.f32.mxu1 %vm2601_vm1, %v2602_v7 }
 0x172   : > { %1964 = vmatprep.subr.bf16.mxu1 %v2600_v4 }
 0x173   : > { %p1688_p13 = scmp.ne.s32.totalorder %s3287_s12, 3 }
 0x175   : > { %1966 = vmatpush3.bf16.msra.mxu1 %v1965_v49 }
 0x176   : > { %1967 = vmatprep.subr.bf16.mxu1 %v2600_v4 }
 0x179   : > { %1969 = vmatpush3.bf16.msra.mxu1 %v1968_v52 }
 0x17a   : > { %1970 = vmatprep.subr.bf16.mxu1 %v2600_v4 }
 0x17d   : > { %1972 = vmatpush3.bf16.msra.mxu1 %v1971_v58  ;;  %v1682_v58 = vld [vmem:[%s3285_s10] ss:$0 sm:$0xff] }
 0x17e   : > { %1985 = vmatprep.subr.bf16.mxu1 %v2600_v4 }
 0x22a   : > { %v811_v62 = vpop.f32.mrb[0].mxu0 }
 0x22b   : > { %v812_v63 = vadd.f32 %v1672_v59, %v811_v62  ;;  %v1773_v0 = vpop.f32.mrb[1].mxu0 }
 0x22d   : > { %v815_v2 = vmax.f32 %v812_v63, 0.0 }
 0x22f   : > { %1810 = vmatmul.mubr.msk.f32.vlgmr.msra.gmra.mrb[2].mxu0 %vm832_vm3, %v815_v2  ;;  %1867 = vmatmul.mubr.msk.f32.vlgmr.msra.gmra.mrb[4].mxu1 %vm832_vm3, %v815_v2 }
 0x230   : > { %1951 = vmatpush3.bf16.msra.mxu0 %v1950_v1  ;;  %1847 = vmatprep.mubr.msk.f32.mxu0 %vm2601_vm1, %v2602_v7 }
 0x231   : > { %1952 = vmatprep.subr.bf16.mxu0 %v2600_v4  ;;  %1904 = vmatprep.mubr.msk.f32.mxu1 %vm2601_vm1, %v2602_v7 }
 0x233   : > { %v902_v11 = vpop.f32.mrb[0].mxu1 }
 0x234   : > { %1954 = vmatpush3.bf16.msra.mxu0 %v1953_v6  ;;  %v1792_v14 = vpop.f32.mrb[1].mxu1 }
 0x235   : > { %1955 = vmatprep.subr.bf16.mxu0 %v2600_v4 }
 0x238   : > { %1957 = vmatpush3.bf16.msra.mxu0 %v1956_v10 }
 0x239   : > { %1958 = vmatprep.subr.bf16.mxu0 %v2600_v4 }
 0x23c   : > { %1960 = vmatpush3.bf16.msra.mxu0 %v1959_v15 }
 0x23d   : > { %1973 = vmatprep.subr.bf16.mxu0 %v2600_v4 }
 0x23f   : > { %1848 = vmatmul.mubr.msk.f32.vlgmr.msra.gmra.mrb[4].mxu0 %vm832_vm3, %v815_v2 }
 0x240   : > { %1975 = vmatpush3.bf16.msra.mxu0 %v1974_v18  ;;  %1885 = vmatprep.mubr.msk.f32.mxu0 %vm2601_vm1, %v2602_v7  ;;  %v1341_v7 = vld [vmem:[#allocation18] sm:$0xff] }
 0x241   : > { %1976 = vmatprep.subr.bf16.mxu0 %v2600_v4  ;;  %v1986_v31 = vpack.c.bf16 %v1342_v30, %v1341_v7 }
 0x243   : > { %v1075_v25 = vpop.f32.mrb[2].mxu1  ;;  %1987 = vmatpush3.bf16.msra.mxu1 %v1986_v31 }
 0x244   : > { %1978 = vmatpush3.bf16.msra.mxu0 %v1977_v21  ;;  %v1830_v28 = vpop.f32.mrb[3].mxu1  ;;  %1988 = vmatprep.subr.bf16.mxu1 %v2600_v4 }
 0x245   : > { %1979 = vmatprep.subr.bf16.mxu0 %v2600_v4 }
 0x247   : > { %1990 = vmatpush3.bf16.msra.mxu1 %v1989_v35 }
 0x248   : > { %1981 = vmatpush3.bf16.msra.mxu0 %v1980_v24  ;;  %1991 = vmatprep.subr.bf16.mxu1 %v2600_v4 }
 0x249   : > { %1982 = vmatprep.subr.bf16.mxu0 %v2600_v4 }
 0x24b   : > { %1993 = vmatpush3.bf16.msra.mxu1 %v1992_v38 }
 0x24c   : > { %1984 = vmatpush3.bf16.msra.mxu0 %v1983_v29  ;;  %1994 = vmatprep.subr.bf16.mxu1 %v2600_v4 }
 0x24f   : > { %1886 = vmatmul.mubr.msk.f32.vlgmr.msra.gmra.mrb[6].mxu0 %vm832_vm3, %v3082_v33  ;;  %1996 = vmatpush3.bf16.msra.mxu1 %v1995_v41 }
 0x302   : > { %v975_v42 = vpop.f32.mrb[2].mxu0  ;;  %v1244_v44 = vpop.f32.mrb[4].mxu1 }
 0x303   : > { %v976_v45 = vadd.f32 %v975_v42, %v902_v11  ;;  %v1811_v46 = vpop.f32.mrb[3].mxu0  ;;  %v1868_v47 = vpop.f32.mrb[5].mxu1  ;;  %v1245_v1 = vadd.f32 %v1682_v58, %v1244_v44 }
 0x305   : > { %v986_v48 = vadd.f32 %v1676_v43, %v976_v45 }
 0x307   : > { %v1677_v49 = vmul.f32 -1.442695, %v986_v48 }
 0x309   : > { %2162 = vpow2.f32 %v1677_v49 }
 0x312   : > { %v1145_v50 = vpop.f32.mrb[4].mxu0 }
 0x313   : > { %v2163_v52 = vpop.eup %2162  ;;  %v1146_v4 = vadd.f32 %v1145_v50, %v1075_v25  ;;  %v1849_v53 = vpop.f32.mrb[5].mxu0 }
 0x314   : > { %v990_v55 = vadd.f32 1.0, %v2163_v52 }
 0x315   : > { %v1156_v54 = vadd.f32 %v1680_v51, %v1146_v4 }
 0x317   : > { %v1681_v56 = vmul.f32 -1.442695, %v1156_v54 }
 0x319   : > { %2164 = vpow2.f32 %v1681_v56 }
 0x31a   : > { %2166 = vrcp.f32 %v990_v55 }
 0x322   : > { %v1329_v59 = vpop.f32.mrb[6].mxu0 }
 0x323   : > { %v2165_v60 = vpop.eup %2164  ;;  %v1330_v61 = vadd.f32 %v1684_v57, %v1329_v59  ;;  %v1887_v62 = vpop.f32.mrb[7].mxu0 }
 0x324   : > { %v2167_v63 = vpop.eup %2166  ;;  %v1160_v0 = vadd.f32 1.0, %v2165_v60 }
 0x325   : > { %v1333_v2 = vmul.f32 %v2167_v63, %v1330_v61 }
 0x326   : > { %2168 = vrcp.f32 %v1160_v0 }
 0x327   : > { %v1334_v3 = vadd.f32 %v1333_v2, %v1245_v1 }
 0x329   : > { %2170 = vtanh.f32 %v1334_v3 }
 0x330   : > { %v2169_v5 = vpop.eup %2168 }
 0x331   : > { %v1336_v6 = vsub.f32 1.0, %v2169_v5  ;;  %v1338_v10 = vmul.f32 %v2169_v5, %v3082_v33 }
 0x333   : > { %v2171_v8 = vpop.eup %2170 }
 0x334   : > { %v1337_v9 = vmul.f32 %v2171_v8, %v1336_v6 }
 0x336   : > { %v1339_v11 = vadd.f32 %v1338_v10, %v1337_v9 }
 0x338   : > { %1340 = vst.msk [vmem:[#allocation2] sm:$0xff] %vm832_vm3, %v1339_v11  ;;  %1905 = vmatmul.mubr.msk.f32.vlgmr.msra.gmra.mrb[6].mxu1 %vm832_vm3, %v1339_v11  ;;  %1434 = vst.msk [vmem:[#allocation21] sm:$0xff] (!%p1688_p13), %vm832_vm3, %v1339_v11 }
 0x408   : > { %1433 = sbr.rel (%p1688_p13) target bundleno = 1039 (0x40f), region = 132 }
 0x40b   : > { %v1425_v13 = vpop.f32.mrb[6].mxu1 }
 0x40c   : > { %v1426_v14 = vadd.f32 %v1686_v12, %v1425_v13  ;;  %v1906_v15 = vpop.f32.mrb[7].mxu1 }
 0x40e   : > { %1429 = vst [vmem:[%s3063_s2] sm:$0xff] %v1426_v14 }
 0x40f PF: > { %s3288_s11 = sld [smem:[#allocation31_spill]]  ;;  %s3289_s0 = sld [smem:[#allocation43_spill]] }
 0x410   : > { %s1450_s18 = sshll.u32 %s3063_s2, 4  ;;  %s1436_s30 = scalar_lea.sflag [#allocation5], %s3033_s5  ;;  %s1451_s18 = int_to_ptr.vmem [resolvable:$true] %s1450_s18 }
 0x411   : > { %s2454_s10 = scalar_lea.vmem %s1451_s18, 128  ;;  %p3290_p6 = scmp.ne.s32.totalorder %s3274_s23, 0 }
 0x412   : > { %p2455_p4 = scmp.ne.s32.totalorder %s1451_s18, %s2454_s10  ;;  %s2603_s3 = smov [#allocation20]  }
 0x413   : > { %s2458_s19 = sshll.u32 %s2603_s3, 4  ;;  %s2459_s19 = int_to_ptr.vmem [resolvable:$false] %s2458_s19 }
 0x414   : > { %p2456_p9 = pnand %p2455_p4, %p3290_p6  ;;  %s2460_s21 = scalar_lea.vmem %s2459_s19, 256 }
 0x415   : > { %s1690_s15 = sshll.u32 %s3288_s11, 7  ;;  %p2461_p0 = scmp.lt.s32.totalorder %s1451_s18, %s2459_s19 }
 0x416   : > { %s3152_s4 = scalar_lea.hbm %s3289_s0, %s1690_s15  ;;  %p2457_p12 = pneg %p2456_p9 }
 0x417   : > { %p2462_p7 = scmp.lt.s32.totalorder %s2460_s21, %s2454_s10 }
 0x419   : > { %p2463_p8 = por %p2462_p7, %p2461_p0 }
 0x41b   : > { %p2464_p1 = pnand %p2463_p8, %p2457_p12 }
 0x41d   : > { %2467 = shalt.err (!%p2464_p1)
}
 0x41e   : > { %s2468_s5 = scalar_lea.hbm %s3152_s4, 128  ;;  %s2472_s11 = scalar_lea.hbm %s3289_s0, 512 }
 0x41f   : > { %p2469_p3 = scmp.ne.s32.totalorder %s3152_s4, %s2468_s5  ;;  %p2473_p10 = scmp.lt.u32.totalorder %s3152_s4, %s3289_s0 }
 0x420   : > { %p2474_p5 = scmp.lt.u32.totalorder %s2472_s11, %s2468_s5  ;;  %p2476_p4 = scmp.lt.u32.totalorder %s2468_s5, %s3152_s4 }
 0x421   : > { %p2470_p11 = pnand %p2469_p3, %p3290_p6 }
 0x422   : > { %p2475_p13 = por %p2474_p5, %p2473_p10 }
 0x423   : > { %p2471_p2 = pneg %p2470_p11 }
 0x424   : > { %p2477_p9 = por %p2476_p4, %p2475_p13 }
 0x426   : > { %p2478_p12 = pnand %p2477_p9, %p2471_p2 }
 0x428   : > { %2481 = shalt.err (!%p2478_p12)
}
 0x429   : > { %2035 = dma.vmem_to_hbm [thread:$0]  (%p3290_p6), %s1451_s18, 128, %s3152_s4, %s1436_s30  }
 0x42a   : > { %s2604_s27 = smov [#allocation21]   ;;  %p3291_p7 = scmp.ne.s32.totalorder %s3273_s22, 0 }
 0x42b   : > { %s1463_s10 = sshll.u32 %s2604_s27, 4  ;;  %s1464_s10 = int_to_ptr.vmem [resolvable:$true] %s1463_s10 }
 0x42c   : > { %s2482_s3 = scalar_lea.vmem %s1464_s10, 128  ;;  %p2489_p3 = scmp.lt.s32.totalorder %s1464_s10, %s1464_s10 }
 0x42d   : > { %p2483_p0 = scmp.ne.s32.totalorder %s1464_s10, %s2482_s3  ;;  %p2490_p11 = scmp.lt.s32.totalorder %s2482_s3, %s2482_s3 }
 0x42f   : > { %p2484_p8 = pnand %p2483_p0, %p3291_p7  ;;  %p2491_p10 = por %p2490_p11, %p2489_p3 }
 0x431   : > { %p2485_p1 = pneg %p2484_p8 }
 0x433   : > { %p2492_p5 = pnand %p2491_p10, %p2485_p1 }
 0x435   : > { %2495 = shalt.err (!%p2492_p5)
}
 0x436   : > { %s3292_s5 = sld [smem:[#allocation44_spill]] }
 0x43c   : > { %s2496_s23 = scalar_lea.hbm %s3292_s5, 128 }
 0x43d   : > { %p2497_p6 = scmp.ne.s32.totalorder %s3292_s5, %s2496_s23  ;;  %p2502_p4 = scmp.lt.u32.totalorder %s2496_s23, %s3292_s5 }
 0x43f   : > { %p2498_p2 = pnand %p2497_p6, %p3291_p7 }
 0x441   : > { %p2499_p13 = pneg %p2498_p2 }
 0x443   : > { %p2504_p9 = pnand %p2502_p4, %p2499_p13 }
 0x445   : > { %2507 = shalt.err (!%p2504_p9)
}
 0x446   : > { %2037 = dma.vmem_to_hbm [thread:$0]  (%p3291_p7), %s1464_s10, 128, %s3292_s5, [#allocation22]  }
 0x447   : > { %2557 = dma.done.wait (%p3291_p7), [#allocation22], 128  }
 0x448   : > { %2559 = vsyncadd (%p3291_p7), [#allocation22], 4294967168 }
 0x449 PF: > { %p2098_p12 = scmp.ge.s32.totalorder %s2586_s29, 2  ;;  %s1479_s15 = sand.u32 1, %s2566_s24  }
 0x44a   : > { %p3293_p0 = scmp.ne.s32.totalorder %s3275_s1, 0  ;;  %s1480_s17 = scalar_lea.sflag [#allocation5], %s1479_s15 }
 0x44c   : > { %p2074_p8 = pnand %p2098_p12, %p3293_p0 }
 0x44e   : > { %2561 = dma.done.wait (!%p2074_p8), %s1480_s17, 128  }
 0x44f   : > { %2563 = vsyncadd (!%p2074_p8), %s1480_s17, 4294967168  ;;  %s40_s29 = sadd.s32 1, %s2586_s29   ;;  %s3294_s24 = smov %s2570_s25 }
 0x450   : > { %p37_p1 = scmp.ge.s32.totalorder %s40_s29, 6   ;;  %s3295_s25 = smov %s2574_s26 }
 0x451   : > { %s3296_s26 = smov %s2984_s16  ;;  %s3297_s27 = smov %s2582_s28 }
 0x452   : > { %s3298_s28 = smov %s3300_s20  ;;  %39 = sbr.rel (!%p37_p1) target bundleno = 26 (0x1a), region = 183 }
 0x459   :  { %1485 = vsyncpa [#allocation4], 1 }
 0x45a   :  { %1487 = vsyncpa [#allocation4 + $0x1], 1 }
 0x45b   :  { %1488 = vsyncpa [#allocation7], 1 }
 0x45c   :  { %1489 = vsyncpa [#allocation10], 1 }
 0x45d   :  { %1490 = vsyncpa [#allocation13], 1 }
 0x45e   :  { %1491 = vsyncpa [#allocation16], 1 }
 0x45f   :  { %1492 = vsyncpa [#allocation19], 1 }
 0x460   :  { %1493 = vsyncpa [#allocation5], 1 }
 0x461   :  { %1495 = vsyncpa [#allocation5 + $0x1], 1 }
 0x462   :  { %1496 = vsyncpa [#allocation22], 1 }

</bundles_post_ra>
